<compile_context>
chip_gen: v7x
topology: tpu7x:2x2x1
jax: 0.10.0
libtpu: 0.0.40
codegen_flags: <defaults>
</compile_context>

<pallas_src>
import math
import functools

import numpy as np
import jax
import jax.numpy as jnp
from jax.experimental import pallas as pl
from jax.experimental.pallas import tpu as pltpu


# ---------------------------------------------------------------------------
# Generation-aware VMEM budgeting helpers
# ---------------------------------------------------------------------------
def _vmem_capacity_bytes():
    """Physical VMEM of the current TPU generation (64 MiB v7x, 128 MiB v5e/v6e)."""
    try:
        info = pltpu.get_tpu_info()
        cap = getattr(info, "vmem_capacity_bytes", None)
        if cap:
            return int(cap)
    except Exception:
        pass
    return 64 * 1024 * 1024  # conservative default (v7x per-TensorCore VMEM)


def _padded_bytes(shape, dtype):
    """Bytes for one VMEM buffer, padding trailing dims to (8, 128) tiles."""
    dims = list(shape)
    if len(dims) >= 1:
        dims[-1] = -(-dims[-1] // 128) * 128
    if len(dims) >= 2:
        dims[-2] = -(-dims[-2] // 8) * 8
    n = 1
    for d in dims:
        n *= int(d)
    return n * np.dtype(dtype).itemsize


# ---------------------------------------------------------------------------
# Kernel 1: feature-importance accumulation
#   grid = (parts, L_K-tiles, batch-steps); each step handles `bt` batches and
#   all heads, accumulating sum_q |Q K^T| into an 8-row sublane-partial
#   accumulator that is collapsed only in the wrapper epilogue.
# ---------------------------------------------------------------------------
def _feat_imp_kernel(q_ref, k_ref, out_ref, *, num_heads, head_dim, acc_rows, bt):
    @pl.when(pl.program_id(2) == 0)
    def _():
        out_ref[...] = jnp.zeros_like(out_ref)

    l_q = q_ref.shape[1]
    tk = k_ref.shape[1]

    partial = jnp.zeros((acc_rows, tk), dtype=jnp.float32)
    # Static unroll over (batch-in-block, head): per-head temporaries are bounded
    # to (L_Q, tk) f32 by the L_K-tile grid axis, so live ranges stay small.
    for b in range(bt):
        for h in range(num_heads):
            lo = h * head_dim
            qh = q_ref[b, :, pl.ds(lo, head_dim)].astype(jnp.bfloat16)   # (L_Q, D)
            kh = k_ref[b, :, pl.ds(lo, head_dim)].astype(jnp.bfloat16)   # (tk,  D)
            s = jax.lax.dot_general(                                     # (L_Q, tk)
                qh, kh, (((1,), (1,)), ((), ())),
                preferred_element_type=jnp.float32)
            a = jnp.abs(s)
            if acc_rows > 1:
                # Keep 8 sublane partials; the 8 -> 1 collapse happens in the wrapper.
                partial = partial + a.reshape(l_q // acc_rows, acc_rows, tk).sum(axis=0)
            else:
                partial = partial + a.sum(axis=0, keepdims=True)
    out_ref[...] += partial


def _feature_importance(q2, k2, num_heads, head_dim):
    # q2: (B, L_Q, H*D), k2: (B, L_K, H*D)  -- untransposed, lane-dense layout
    B, L_Q, HD = q2.shape
    _, L_K, _ = k2.shape

    acc_rows = 8 if (L_Q % 8 == 0) else 1
    # Megacore split over the batch axis when possible; the L_K-tile axis below
    # gives a second "parallel" axis so odd-B / large-L cases still use both TCs.
    parts = 2 if (B % 2 == 0 and B >= 2 and acc_rows == 8) else 1
    per_part = B // parts

    cap = _vmem_capacity_bytes()
    budget = int(0.70 * cap)

    tk_opts = [c for c in (512, 256, 128) if L_K % c == 0] or [L_K]
    bt_opts = [c for c in (4, 2, 1) if per_part % c == 0]

    def est(bt, tk):
        e = 2 * _padded_bytes((bt, L_Q, HD), q2.dtype)        # Q (double buffered)
        e += 2 * _padded_bytes((bt, tk, HD), k2.dtype)        # K (double buffered)
        e += 2 * _padded_bytes((acc_rows, tk), jnp.float32)   # accumulator output
        e += 3 * _padded_bytes((L_Q, tk), jnp.float32)        # f32 score temporaries
        e += 2 * _padded_bytes((L_Q, head_dim), jnp.bfloat16)
        e += 2 * _padded_bytes((tk, head_dim), jnp.bfloat16)
        return e + (2 << 20)                                  # misc compiler scratch

    bt, tk = 1, tk_opts[-1]
    chosen = False
    for tkc in tk_opts:
        for btc in bt_opts:
            if est(btc, tkc) <= budget:
                bt, tk = btc, tkc
                chosen = True
                break
        if chosen:
            break

    n_kt = L_K // tk
    steps = per_part // bt
    vmem_limit = int(min(max(est(bt, tk), 32 * 1024 * 1024), 0.9 * cap))

    q_block = (bt, L_Q, HD)
    k_block = (bt, tk, HD)
    out_block = (acc_rows, tk)

    partials = pl.pallas_call(
        functools.partial(_feat_imp_kernel, num_heads=num_heads,
                          head_dim=head_dim, acc_rows=acc_rows, bt=bt),
        out_shape=jax.ShapeDtypeStruct((parts * acc_rows, L_K), jnp.float32),
        grid_spec=pltpu.PrefetchScalarGridSpec(
            num_scalar_prefetch=0,
            grid=(parts, n_kt, steps),
            in_specs=[
                pl.BlockSpec(q_block, lambda p, kt, i: (p * steps + i, 0, 0)),
                pl.BlockSpec(k_block, lambda p, kt, i: (p * steps + i, kt, 0)),
            ],
            out_specs=pl.BlockSpec(out_block, lambda p, kt, i: (p, kt)),
        ),
        compiler_params=pltpu.CompilerParams(
            dimension_semantics=("parallel", "parallel", "arbitrary"),
            vmem_limit_bytes=vmem_limit,
        ),
    )(q2, k2)

    feat_sum = partials.sum(axis=0)                           # (L_K,)
    feat_imp = feat_sum / jnp.float32(B * num_heads * L_Q)    # mean over (B, H, L_Q)
    return feat_imp / feat_imp.sum()


# ---------------------------------------------------------------------------
# Kernel 2: attention on the already-gathered selected rows.
#   Inputs are (B, nf, H*D); each grid step handles `bt` batches, all heads,
#   and emits one lane-dense (bt, nf, H*D) output block.
# ---------------------------------------------------------------------------
def _attn_kernel(q_ref, k_ref, v_ref, o_ref, *, num_heads, head_dim, scale, bt):
    for b in range(bt):
        ctx_heads = []
        for h in range(num_heads):
            lo = h * head_dim
            qh = q_ref[b, :, pl.ds(lo, head_dim)].astype(jnp.bfloat16)   # (nf, D)
            kh = k_ref[b, :, pl.ds(lo, head_dim)].astype(jnp.bfloat16)   # (nf, D)
            vh = v_ref[b, :, pl.ds(lo, head_dim)].astype(jnp.bfloat16)   # (nf, D)

            s = jax.lax.dot_general(qh, kh, (((1,), (1,)), ((), ())),
                                    preferred_element_type=jnp.float32) * scale
            s = s - jnp.max(s, axis=-1, keepdims=True)
            p = jnp.exp(s)
            p = p * pl.reciprocal(jnp.sum(p, axis=-1, keepdims=True), approx=True)
            ctx_heads.append(jnp.dot(p.astype(jnp.bfloat16), vh,
                                     preferred_element_type=jnp.float32))  # (nf, D)

        # Single full-width lane-dense store per batch (no per-head masked stores).
        ctx = ctx_heads[0] if num_heads == 1 else jnp.concatenate(ctx_heads, axis=-1)
        o_ref[b, :, :] = ctx.astype(o_ref.dtype)


def _selected_attention(q_sel, k_sel, v_sel, num_heads, head_dim, scale, out_dtype):
    B, nf, HD = q_sel.shape

    cap = _vmem_capacity_bytes()
    budget = int(0.70 * cap)

    def est(bt):
        e = 3 * 2 * _padded_bytes((bt, nf, HD), q_sel.dtype)   # q/k/v double-buffered
        e += 2 * _padded_bytes((bt, nf, HD), out_dtype)        # output
        e += 4 * _padded_bytes((nf, nf), jnp.float32)          # scores / probs
        e += 2 * _padded_bytes((nf, HD), jnp.float32)          # concat ctx buffer
        e += 6 * _padded_bytes((nf, head_dim), jnp.bfloat16)   # per-head bf16 casts
        return e + (2 << 20)

    bt = 1
    for c in (4, 2, 1):
        if B % c == 0 and est(c) <= budget:
            bt = c
            break

    steps = B // bt
    vmem_limit = int(min(max(est(bt), 32 * 1024 * 1024), 0.9 * cap))

    blk = (bt, nf, HD)
    return pl.pallas_call(
        functools.partial(_attn_kernel, num_heads=num_heads, head_dim=head_dim,
                          scale=scale, bt=bt),
        out_shape=jax.ShapeDtypeStruct((B, nf, HD), out_dtype),
        grid_spec=pltpu.PrefetchScalarGridSpec(
            num_scalar_prefetch=0,
            grid=(steps,),
            in_specs=[
                pl.BlockSpec(blk, lambda i: (i, 0, 0)),
                pl.BlockSpec(blk, lambda i: (i, 0, 0)),
                pl.BlockSpec(blk, lambda i: (i, 0, 0)),
            ],
            out_specs=pl.BlockSpec(blk, lambda i: (i, 0, 0)),
        ),
        compiler_params=pltpu.CompilerParams(
            dimension_semantics=("parallel",),
            vmem_limit_bytes=vmem_limit,
        ),
    )(q_sel, k_sel, v_sel)


# ---------------------------------------------------------------------------
# Full ProbAttention forward (output_attention=False path)
# ---------------------------------------------------------------------------
def prob_attention_forward(queries, keys, values, *, scale=None,
                           sample_ratio=0.5, output_attention=False):
    B, L_Q, H, D = queries.shape
    _, L_K, _, _ = keys.shape
    HD = H * D

    # Free layout change (metadata only): fold (H, D) into one lane-dense axis.
    q2 = queries.reshape(B, L_Q, HD)
    k2 = keys.reshape(B, L_K, HD)
    v2 = values.reshape(B, L_K, HD)

    # Probabilistic feature selection (importance computed by the Pallas kernel).
    feat_imp = _feature_importance(q2, k2, H, D)
    num_features = max(1, int(L_K * sample_ratio))
    _, selected = jax.lax.top_k(feat_imp, num_features)  # descending, like torch.topk

    # One XLA row-gather; kernel 2 then only streams the nf selected rows.
    # TODO(synk): if L_Q != L_K the torch query gather is ill-defined; jnp.take
    # clips out-of-range indices instead of raising like torch would.
    q_sel = jnp.take(q2, selected, axis=1)
    k_sel = jnp.take(k2, selected, axis=1)
    v_sel = jnp.take(v2, selected, axis=1)

    scale_val = float(scale) if scale is not None else 1.0 / math.sqrt(D)

    ctx = _selected_attention(q_sel, k_sel, v_sel, H, D, scale_val,
                              queries.dtype)              # (B, nf, H*D)
    context = ctx.reshape(B, num_features, H, D)          # == context.transpose(2,1)
    # TODO(synk): output_attention=True path (attention-matrix / feature-weight
    # dict) is not produced by the kernels; only the default False path is implemented.
    return context, None


# ---------------------------------------------------------------------------
# Pure-JAX reference mirroring the kernel precision policy
# (bf16 MXU operands, f32 accumulation) for the self-test.
# ---------------------------------------------------------------------------
def _reference(queries, keys, values, scale=None, sample_ratio=0.5):
    B, L_Q, H, D = queries.shape
    _, L_K, _, _ = keys.shape
    q = jnp.transpose(queries, (0, 2, 1, 3))
    k = jnp.transpose(keys, (0, 2, 1, 3))
    v = jnp.transpose(values, (0, 2, 1, 3))

    scores = jnp.einsum("bhqd,bhkd->bhqk", q.astype(jnp.bfloat16),
                        k.astype(jnp.bfloat16),
                        preferred_element_type=jnp.float32)
    fi = jnp.mean(jnp.abs(scores), axis=(0, 1, 2))
    fi = fi / fi.sum()
    nf = max(1, int(L_K * sample_ratio))
    _, sel = jax.lax.top_k(fi, nf)
    qs = jnp.take(q, sel, axis=2)
    ks = jnp.take(k, sel, axis=2)
    vs = jnp.take(v, sel, axis=2)
    sc = scale if scale is not None else 1.0 / math.sqrt(D)
    s = jnp.einsum("bhqd,bhkd->bhqk", qs.astype(jnp.bfloat16),
                   ks.astype(jnp.bfloat16),
                   preferred_element_type=jnp.float32) * sc
    a = jax.nn.softmax(s, axis=-1)
    c = jnp.einsum("bhqk,bhkd->bhqd", a.astype(jnp.bfloat16),
                   vs.astype(jnp.bfloat16),
                   preferred_element_type=jnp.float32)
    return jnp.transpose(c, (0, 2, 1, 3))


if __name__ == "__main__":
    key = jax.random.PRNGKey(0)
    B, L, H, D = 2, 8, 2, 32
    kq, kk, kv = jax.random.split(key, 3)
    queries = jax.random.normal(kq, (B, L, H, D), dtype=jnp.float32)
    keys = jax.random.normal(kk, (B, L, H, D), dtype=jnp.float32)
    values = jax.random.normal(kv, (B, L, H, D), dtype=jnp.float32)

    context, attn_info = prob_attention_forward(queries, keys, values)
    context = jax.block_until_ready(context)

    ref = _reference(queries, keys, values)
    assert context.shape == ref.shape, (context.shape, ref.shape)
    max_err = float(jnp.max(jnp.abs(context - ref)))
    assert jnp.allclose(context, ref, atol=3e-2, rtol=3e-2), (
        f"mismatch vs reference (max abs err {max_err})")
    assert attn_info is None

    print("KERNEL_OK")
</pallas_src>

<mosaic_0001>
module attributes {stable_mosaic.version = 11 : i64} {
  func.func @_feat_imp_kernel(%arg0: i32, %arg1: i32, %arg2: i32, %arg3: memref<1x8x64xf32, #tpu.memory_space<vmem>>, %arg4: memref<1x8x64xf32, #tpu.memory_space<vmem>>, %arg5: memref<8x8xf32, #tpu.memory_space<vmem>>) attributes {dimension_semantics = [#tpu.dimension_semantics<parallel>, #tpu.dimension_semantics<parallel>, #tpu.dimension_semantics<arbitrary>], iteration_bounds = array<i64: 2, 1, 1>, scalar_prefetch = 0 : i64, scratch_operands = 0 : i64, tpu.core_type = #tpu.core_type<tc>, window_params = [{transform_indices = @transform_0, window_bounds = array<i64: 1, 8, 64>}, {transform_indices = @transform_1, window_bounds = array<i64: 1, 8, 64>}, {transform_indices = @transform_2, window_bounds = array<i64: 8, 8>}]} {
    %c0_i32 = arith.constant 0 : i32
    %0 = arith.cmpi eq, %arg2, %c0_i32 : i32
    %1 = arith.extui %0 : i1 to i32
    %c0_i32_0 = arith.constant 0 : i32
    %2 = arith.cmpi ne, %1, %c0_i32_0 : i32
    scf.if %2 {
      %cst_19 = arith.constant 0.000000e+00 : f32
      %29 = vector.broadcast %cst_19 : f32 to vector<8x8xf32>
      %c0_20 = arith.constant 0 : index
      %c0_21 = arith.constant 0 : index
      %30 = vector.load %arg5[%c0_20, %c0_21] : memref<8x8xf32, #tpu.memory_space<vmem>>, vector<8x8xf32>
      tpu.vector_store %arg5[%c0_20, %c0_21], %29 {strides = array<i32>} : memref<8x8xf32, #tpu.memory_space<vmem>>, vector<8x8xf32>,
    } else {
    }
    %cst = arith.constant 0.000000e+00 : f32
    %3 = vector.broadcast %cst : f32 to vector<8x8xf32>
    %c0 = arith.constant 0 : index
    %c0_1 = arith.constant 0 : index
    %c0_2 = arith.constant 0 : index
    %4 = vector.load %arg3[%c0, %c0_1, %c0_2] : memref<1x8x64xf32, #tpu.memory_space<vmem>>, vector<1x8x32xf32>
    %5 = vector.shape_cast %4 : vector<1x8x32xf32> to vector<8x32xf32>
    %6 = arith.truncf %5 : vector<8x32xf32> to vector<8x32xbf16>
    %c0_3 = arith.constant 0 : index
    %c0_4 = arith.constant 0 : index
    %c0_5 = arith.constant 0 : index
    %7 = vector.load %arg4[%c0_3, %c0_4, %c0_5] : memref<1x8x64xf32, #tpu.memory_space<vmem>>, vector<1x8x32xf32>
    %8 = vector.shape_cast %7 : vector<1x8x32xf32> to vector<8x32xf32>
    %9 = arith.truncf %8 : vector<8x32xf32> to vector<8x32xbf16>
    %cst_6 = arith.constant dense<0.000000e+00> : vector<8x8xf32>
    %10 = tpu.matmul %6, %9, %cst_6 {dimension_numbers = #tpu.dot_dimension_numbers<[1], [1], [0], [0], [0, 0, 1, 0], [], []>} : vector<8x32xbf16>, vector<8x32xbf16>, vector<8x8xf32> -> vector<8x8xf32>
    %11 = math.absf %10 : vector<8x8xf32>
    %12 = vector.shape_cast %11 : vector<8x8xf32> to vector<1x8x8xf32>
    %cst_7 = arith.constant dense<0.000000e+00> : vector<8x8xf32>
    %13 = vector.multi_reduction <add>, %12, %cst_7 [0] : vector<1x8x8xf32> to vector<8x8xf32>
    %14 = arith.addf %3, %13 : vector<8x8xf32>
    %c0_8 = arith.constant 0 : index
    %c0_9 = arith.constant 0 : index
    %c32 = arith.constant 32 : index
    %15 = vector.load %arg3[%c0_8, %c0_9, %c32] : memref<1x8x64xf32, #tpu.memory_space<vmem>>, vector<1x8x32xf32>
    %16 = vector.shape_cast %15 : vector<1x8x32xf32> to vector<8x32xf32>
    %17 = arith.truncf %16 : vector<8x32xf32> to vector<8x32xbf16>
    %c0_10 = arith.constant 0 : index
    %c0_11 = arith.constant 0 : index
    %c32_12 = arith.constant 32 : index
    %18 = vector.load %arg4[%c0_10, %c0_11, %c32_12] : memref<1x8x64xf32, #tpu.memory_space<vmem>>, vector<1x8x32xf32>
    %19 = vector.shape_cast %18 : vector<1x8x32xf32> to vector<8x32xf32>
    %20 = arith.truncf %19 : vector<8x32xf32> to vector<8x32xbf16>
    %cst_13 = arith.constant dense<0.000000e+00> : vector<8x8xf32>
    %21 = tpu.matmul %17, %20, %cst_13 {dimension_numbers = #tpu.dot_dimension_numbers<[1], [1], [0], [0], [0, 0, 1, 0], [], []>} : vector<8x32xbf16>, vector<8x32xbf16>, vector<8x8xf32> -> vector<8x8xf32>
    %22 = math.absf %21 : vector<8x8xf32>
    %23 = vector.shape_cast %22 : vector<8x8xf32> to vector<1x8x8xf32>
    %cst_14 = arith.constant dense<0.000000e+00> : vector<8x8xf32>
    %24 = vector.multi_reduction <add>, %23, %cst_14 [0] : vector<1x8x8xf32> to vector<8x8xf32>
    %25 = arith.addf %14, %24 : vector<8x8xf32>
    %c0_15 = arith.constant 0 : index
    %c0_16 = arith.constant 0 : index
    %26 = vector.load %arg5[%c0_15, %c0_16] : memref<8x8xf32, #tpu.memory_space<vmem>>, vector<8x8xf32>
    %27 = arith.addf %26, %25 : vector<8x8xf32>
    %c0_17 = arith.constant 0 : index
    %c0_18 = arith.constant 0 : index
    %28 = vector.load %arg5[%c0_17, %c0_18] : memref<8x8xf32, #tpu.memory_space<vmem>>, vector<8x8xf32>
    tpu.vector_store %arg5[%c0_17, %c0_18], %27 {strides = array<i32>} : memref<8x8xf32, #tpu.memory_space<vmem>>, vector<8x8xf32>,
    return
  }
  func.func @transform_0(%arg0: i32, %arg1: i32, %arg2: i32) -> (i32, i32, i32) {
    %c1_i32 = arith.constant 1 : i32
    %0 = arith.muli %arg0, %c1_i32 : i32
    %1 = arith.addi %0, %arg2 : i32
    %c0_i32 = arith.constant 0 : i32
    %c0_i32_0 = arith.constant 0 : i32
    %c0_i32_1 = arith.constant 0 : i32
    return %1, %c0_i32, %c0_i32_0 : i32, i32, i32
  }
  func.func @transform_1(%arg0: i32, %arg1: i32, %arg2: i32) -> (i32, i32, i32) {
    %c1_i32 = arith.constant 1 : i32
    %0 = arith.muli %arg0, %c1_i32 : i32
    %1 = arith.addi %0, %arg2 : i32
    %c0_i32 = arith.constant 0 : i32
    %c0_i32_0 = arith.constant 0 : i32
    return %1, %arg1, %c0_i32 : i32, i32, i32
  }
  func.func @transform_2(%arg0: i32, %arg1: i32, %arg2: i32) -> (i32, i32) {
    %c0_i32 = arith.constant 0 : i32
    return %arg0, %arg1 : i32, i32
  }
}

</mosaic_0001>

<bundles_post_ra>
// kernel: tpu_custom_call.1
= control target key start
LH: loop header
LB: loop body
LE: loop exit
PB: predicated region body
PF: predicated region fallthrough
CT: control target
= control target key end

     0   :  { %7 = vsyncpa [#allocation3], 0  ;;  %s876_s0 = inlined_call_operand.hbm [shape: f32[2,8,64], index: 0, kind: input, shape index: {}]   ;;  %s877_s1 = inlined_call_operand.hbm [shape: f32[2,8,64], index: 1, kind: input, shape index: {}]   ;;  %s878_s2 = inlined_call_operand.vmem [shape: f32[16,8], index: 2, kind: output, shape index: {}]  }
   0x1   :  { %9 = vsyncpa [#allocation3 + $0x1], 0 }
   0x2   :  { %10 = vsyncpa [#allocation5], 0 }
   0x3   :  { %12 = vsyncpa [#allocation5 + $0x1], 0  ;;  %s697_s9 = smov 0   ;;  %s699_s10 = smov 0  }
   0x4   :  { %s701_s11 = smov 0   ;;  %s703_s12 = smov 0  }
   0x5   :  { %s705_s13 = smov 0   ;;  %s707_s14 = smov 0  }
   0x6 LB: > { %s466_s15 = sadd.s32 4294967295, %s675_s14   ;;  %s37_s16 = sadd.s32 1, %s671_s13  ;;  %s675_s14 = sphi %s707_s14, %s18_s14   ;;  %s671_s13 = sphi %s705_s13, %s892_s13   ;;  %s667_s12 = sphi %s703_s12, %s891_s12   ;;  %s663_s11 = sphi %s701_s11, %s890_s11   ;;  %s659_s10 = sphi %s699_s10, %s889_s10   ;;  %s655_s9 = sphi %s697_s9, %s888_s9  }
   0x7   : > { %p39_p0 = scmp.ge.s32.totalorder %s37_s16, 2  ;;  %s46_s17 = sadd.s32 1, %s663_s11 }
   0x8   : > { %p53_p1 = scmp.ne.s32.totalorder %s663_s11, %s659_s10  ;;  %p54_p2 = scmp.eq.s32.totalorder %s675_s14, 0 }
   0x9   : > { %s894_s16 = smov (%p39_p0, %s37_s16), 0  ;;  %p59_p4 = scmp.ne.s32.totalorder %s659_s10, %s655_s9 }
   0xa   : > { %p733_p3 = por %p54_p2, %p53_p1  ;;  %s43_s19 = ssub.s32 %s671_s13, %s894_s16 }
   0xb   : > { %p60_p5 = scmp.eq.s32.totalorder %s466_s15, 0  ;;  %p44_p6 = scmp.eq.s32.totalorder %s43_s19, 0 }
   0xc   : > { %p509_p8 = scmp.lt.s32.totalorder %s675_s14, 2  ;;  %s749_s22 = sand.u32 1, %s663_s11  }
   0xd   : > { %p740_p7 = por %p60_p5, %p59_p4  ;;  %s471_s23 = sshll.u32 %s671_s13, 7 }
   0xe   : > { %s746_s21 = scalar_select %p44_p6, %s663_s11, %s46_s17  }
   0xf   : > { %s881_s20 = scalar_select %p740_p7, 1, 0 }
  0x10   : > { %s470_s24 = sshll.u32 %s749_s22, 3  ;;  %s758_s27 = scalar_lea.hbm %s876_s0, %s471_s23 }
  0x11   : > { %s145_s28 = scalar_lea.vmem [#allocation2], %s470_s24  ;;  %p764_p9 = pnand %p509_p8, %p733_p3 }
  0x12   : > { %s153_s29 = sshll.u32 %s145_s28, 4  ;;  %s142_s3 = scalar_lea.sflag [#allocation3], %s749_s22  ;;  %s768_s29 = int_to_ptr.vmem [resolvable:$true] %s153_s29 }
  0x13   : > { %s561_s4 = scalar_lea.hbm %s758_s27, 128  ;;  %p563_p13 = pneg %p764_p9 }
  0x14   : > { %p562_p12 = scmp.ne.s32.totalorder %s758_s27, %s561_s4  ;;  %s566_s7 = scalar_lea.hbm %s876_s0, 256 }
  0x15   : > { %p567_p2 = scmp.lt.u32.totalorder %s758_s27, %s876_s0  ;;  %p568_p3 = scmp.lt.u32.totalorder %s566_s7, %s561_s4 }
  0x16   : > { %p564_p0 = pnand %p563_p13, %p562_p12  ;;  %p570_p5 = scmp.lt.u32.totalorder %s561_s4, %s758_s27 }
  0x17   : > { %p569_p4 = por %p568_p3, %p567_p2 }
  0x18   : > { %p565_p1 = pneg %p564_p0 }
  0x19   : > { %p571_p6 = por %p570_p5, %p569_p4 }
  0x1b   : > { %p572_p8 = pnand %p571_p6, %p565_p1 }
  0x1d   : > { %575 = shalt.err (!%p572_p8)
}
  0x1e   : > { %s576_s15 = scalar_lea.vmem %s768_s29, 128  ;;  %s677_s17 = smov [#allocation2]  }
  0x1f   : > { %p577_p12 = scmp.ne.s32.totalorder %s768_s29, %s576_s15  ;;  %s581_s18 = sshll.u32 %s677_s17, 4  ;;  %s582_s18 = int_to_ptr.vmem [resolvable:$false] %s581_s18 }
  0x20   : > { %s583_s19 = scalar_lea.vmem %s582_s18, 256  ;;  %p584_p11 = scmp.lt.s32.totalorder %s768_s29, %s582_s18 }
  0x21   : > { %p579_p0 = pnand %p577_p12, %p563_p13  ;;  %p585_p2 = scmp.lt.s32.totalorder %s583_s19, %s576_s15 }
  0x23   : > { %p580_p10 = pneg %p579_p0  ;;  %p586_p3 = por %p585_p2, %p584_p11 }
  0x25   : > { %p587_p4 = pnand %p586_p3, %p580_p10 }
  0x27   : > { %590 = shalt.err (!%p587_p4)
}
  0x28   : > { %505 = dma.hbm_to_vmem [thread:$0]  (!%p764_p9), %s758_s27, 128, %s768_s29, %s142_s3  }
  0x29   : > { %p883_p1 = scmp.lt.s32.totalorder %s675_s14, 3  ;;  %p884_p5 = scmp.ge.s32.totalorder %s675_s14, 1 }
  0x2a   : > { %s811_s4 = scalar_lea.hbm %s877_s1, %s471_s23  ;;  %s164_s5 = scalar_lea.vmem [#allocation4], %s470_s24 }
  0x2b   : > { %p802_p6 = pnand %p884_p5, %p883_p1  ;;  %s173_s6 = sshll.u32 %s164_s5, 4  ;;  %s174_s6 = int_to_ptr.vmem [resolvable:$true] %s173_s6 }
  0x2c   : > { %s161_s27 = scalar_lea.sflag [#allocation5], %s749_s22  ;;  %s591_s29 = scalar_lea.hbm %s811_s4, 128 }
  0x2d   : > { %s885_s25 = scalar_select %p802_p6, 1, 0 }
  0x2e   : > { %p592_p10 = scmp.ne.s32.totalorder %s811_s4, %s591_s29  ;;  %s596_s23 = scalar_lea.hbm %s877_s1, 256 }
  0x2f   : > { %p597_p12 = scmp.lt.u32.totalorder %s811_s4, %s877_s1  ;;  %p598_p0 = scmp.lt.u32.totalorder %s596_s23, %s591_s29 }
  0x30   : > { %p594_p11 = pnand %p592_p10, %p563_p13  ;;  %p600_p3 = scmp.lt.u32.totalorder %s591_s29, %s811_s4 }
  0x31   : > { %p599_p2 = por %p598_p0, %p597_p12 }
  0x32   : > { %p595_p8 = pneg %p594_p11 }
  0x33   : > { %p601_p4 = por %p600_p3, %p599_p2 }
  0x35   : > { %p602_p1 = pnand %p601_p4, %p595_p8 }
  0x37   : > { %605 = shalt.err (!%p602_p1)
}
  0x38   : > { %s606_s22 = scalar_lea.vmem %s174_s6, 128  ;;  %s678_s24 = smov [#allocation4]  }
  0x39   : > { %p607_p5 = scmp.ne.s32.totalorder %s174_s6, %s606_s22  ;;  %s611_s15 = sshll.u32 %s678_s24, 4  ;;  %s612_s15 = int_to_ptr.vmem [resolvable:$false] %s611_s15 }
  0x3a   : > { %s613_s17 = scalar_lea.vmem %s612_s15, 256  ;;  %p614_p7 = scmp.lt.s32.totalorder %s174_s6, %s612_s15 }
  0x3b   : > { %p609_p10 = pnand %p607_p5, %p563_p13  ;;  %p615_p6 = scmp.lt.s32.totalorder %s613_s17, %s606_s22 }
  0x3d   : > { %p610_p11 = pneg %p609_p10  ;;  %p616_p0 = por %p615_p6, %p614_p7 }
  0x3f   : > { %p617_p12 = pnand %p616_p0, %p610_p11 }
  0x41   : > { %620 = shalt.err (!%p617_p12)
}
  0x42   : > { %508 = dma.hbm_to_vmem [thread:$0]  (!%p764_p9), %s811_s4, 128, %s174_s6, %s161_s27  }
  0x43   : > { %p886_p8 = scmp.ne.s32.totalorder %s885_s25, 0 }
  0x44   : > { %s184_s18 = sand.u32 (!%p886_p8), 1, %s659_s10   ;;  %p887_p13 = scmp.ne.s32.totalorder (!%p886_p8), %s881_s20, 0 }
  0x45   : > { %182 = sbr.rel (%p886_p8) target bundleno = 424 (0x1a8), region = 28  ;;  %s475_s19 = sshll.u32 (!%p886_p8), %s184_s18, 3 }
  0x46   : > { %s185_s26 = scalar_lea.sflag (!%p886_p8), [#allocation3], %s184_s18  ;;  %s188_s28 = scalar_lea.vmem (!%p886_p8), [#allocation2], %s475_s19 }
  0x4c   : > { %646 = dma.done.wait (%p887_p13), %s185_s26, 128  }
  0x4d   : > { %648 = vsyncadd (%p887_p13), %s185_s26, 4294967168  ;;  %s194_s5 = scalar_lea.sflag [#allocation5], %s184_s18  ;;  %s197_s29 = scalar_lea.vmem [#allocation4], %s475_s19 }
  0x4e   : > { %650 = dma.done.wait (%p887_p13), %s194_s5, 128  }
  0x4f   : > { %652 = vsyncadd (%p887_p13), %s194_s5, 4294967168  ;;  %p227_p7 = scmp.lt.s32.totalorder %s667_s12, 1  ;;  %v679_v0 = vmov 0.0   ;;  %vm680_vm0 = vmmov 0   ;;  %vm239_vm1 = vcmask 64512   ;;  %v243_v1 = vld [vmem:[%s197_s29] sm:$0xff] }
  0x50   : > { %486 = vmatprep.subr.bf16.mxu0 %v679_v0  ;;  %492 = vmatprep.subr.bf16.mxu1 %v679_v0  ;;  %v241_v2 = vld [vmem:[%s188_s28] sm:$0xff]  ;;  %vm245_vm2 = vcmask 261120   ;;  %v244_v3 = vpack.c.bf16 %v243_v1, %v243_v1  ;;  %s681_s20 = smov 96  }
  0x51   : > { %s896_s12 = smov (!%p227_p7, %s667_s12), 1  ;;  %488 = vmatprep.mubr.msk.bf16.mxu0 %vm680_vm0, %v679_v0  ;;  %494 = vmatprep.mubr.msk.bf16.mxu1 %vm680_vm0, %v679_v0  ;;  %v242_v4 = vpack.c.bf16 %v241_v2, %v241_v2 }
  0x52   : > { %s477_s30 = sshll.u32 %s896_s12, 3  ;;  %299 = vrot.lane.b32.xlu0 %v244_v3, %s681_s20  ;;  %v250_v5 = vsel %vm245_vm2, %v244_v3, 0 }
  0x53   : > { %s851_s6 = scalar_lea.vmem %s878_s2, %s477_s30  ;;  %487 = vmatpush3.bf16.xpose.msra.mxu0 %v250_v5 }
  0x54   : > { %240 = vst.msk [vmem:[%s851_s6] sm:$0xff] %vm239_vm1, %v679_v0 }
  0x56   : > { %296 = vrot.lane.b32.xlu0 %v242_v4, %s681_s20 }
  0x5a   : > { %489 = vmatmul.mubr.msk.bf16.vlgmr.msra.gmra.mrb[0].mxu0 %vm245_vm2, %v242_v4 }
  0x5b   : > { %v350_v17 = vld [vmem:[%s851_s6] sm:$0xff] }
  0xc4   : > { %v300_v6 = vpop.permute.xlu0 %299 }
  0xc5   : > { %v305_v7 = vsel %vm245_vm2, %v300_v6, 0 }
  0xc6   : > { %493 = vmatpush3.bf16.xpose.msra.mxu1 %v305_v7 }
  0xc8   : > { %v297_v8 = vpop.permute.xlu0 %296 }
  0xcd   : > { %495 = vmatmul.mubr.msk.bf16.vlgmr.msra.gmra.mrb[0].mxu1 %vm245_vm2, %v297_v8 }
 0x12d   : > { %v286_v9 = vpop.f32.mrb[0].mxu0 }
 0x12e   : > { %v490_v10 = vpop.f32.mrb[1].mxu0  ;;  %v292_v13 = vand.u32 2147483647, %v286_v9 }
 0x12f   : > { %v289_v11 = vpop.f32.mrb[2].mxu0 }
 0x130   : > { %v491_v12 = vpop.f32.mrb[3].mxu0 }
 0x1a0   : > { %v341_v14 = vpop.f32.mrb[0].mxu1 }
 0x1a1   : > { %v347_v15 = vand.u32 2147483647, %v341_v14  ;;  %v496_v16 = vpop.f32.mrb[1].mxu1 }
 0x1a2   : > { %v344_v18 = vpop.f32.mrb[2].mxu1 }
 0x1a3   : > { %v349_v19 = vadd.f32 %v347_v15, %v292_v13  ;;  %v497_v20 = vpop.f32.mrb[3].mxu1 }
 0x1a5   : > { %v351_v21 = vadd.f32 %v350_v17, %v349_v19 }
 0x1a7   : > { %353 = vst.msk [vmem:[%s851_s6] sm:$0xff] %vm239_vm1, %v351_v21 }
 0x1a8 PF: > { %s18_s14 = sadd.s32 1, %s675_s14   ;;  %s888_s9 = smov %s659_s10 }
 0x1a9   : > { %p15_p9 = scmp.ge.s32.totalorder %s18_s14, 4   ;;  %s889_s10 = smov %s663_s11 }
 0x1aa   : > { %s890_s11 = smov %s746_s21  ;;  %s891_s12 = smov %s671_s13 }
 0x1ab   : > { %s892_s13 = smov %s894_s16  ;;  %17 = sbr.rel (!%p15_p9) target bundleno = 6 (0x6), region = 85 }
 0x1b2   :  { %379 = vsyncpa [#allocation3], 1 }
 0x1b3   :  { %381 = vsyncpa [#allocation3 + $0x1], 1 }
 0x1b4   :  { %382 = vsyncpa [#allocation5], 1 }
 0x1b5   :  { %384 = vsyncpa [#allocation5 + $0x1], 1 }

</bundles_post_ra>
